<compile_context>
chip_gen: v7x
topology: tpu7x:2x2x1
jax: 0.10.0
libtpu: 0.0.40
codegen_flags: <defaults>
</compile_context>

<pallas_src>
import jax
import jax.numpy as jnp
from jax.experimental import pallas as pl
from jax.experimental.pallas import tpu as pltpu


_VPU_MAX_L = 8            # unrolled VPU contraction for L <= this, MXU above
_BLOCK_BUDGET = 4 << 20   # target bytes per (input or output) block
_VMEM_LIMIT = 32 << 20    # scoped VMEM: fits v5e/v6e (128 MiB) and v7x (64 MiB)


def _round_up(x, m):
    return ((x + m - 1) // m) * m


def _make_vpu_kernel(L):
    """Small-L path: exact f32 unrolled VPU contraction (no MXU round-trips)."""

    def kernel(w_ref, x_ref, o_ref):
        # w_ref : SMEM (L, L) f32   Charbonnier weights, exp(s) folded in.
        # x_ref : VMEM (Bt, L, T)
        # o_ref : VMEM (Bt, L, T)
        x = x_ref[...]
        xs = [x[:, i, :] for i in range(L)]            # (Bt, T) channel slabs
        for o in range(L):
            acc = w_ref[o, 0] * xs[0]
            for i in range(1, L):
                acc = acc + w_ref[o, i] * xs[i]
            o_ref[:, pl.ds(o, 1), :] = acc[:, None, :].astype(o_ref.dtype)

    return kernel


def _make_mxu_kernel(b_tile):
    """Large-L path: per-batch MXU matmul (channels on sublanes, HW on lanes)."""

    def kernel(w_ref, x_ref, o_ref):
        # w_ref : VMEM (L, L) f32 (constant index_map -> resident across steps)
        # x_ref : VMEM (Bt, L, T);  o_ref : VMEM (Bt, L, T)
        w = w_ref[...]
        for b in range(b_tile):
            o_ref[b] = jnp.dot(
                w, x_ref[b],
                precision=jax.lax.Precision.HIGHEST,   # exact f32; hidden by HBM time
                preferred_element_type=jnp.float32,
            ).astype(o_ref.dtype)

    return kernel


def _choose_tiles(bs, L, hw, use_mxu):
    """VMEM-budget-derived (B_TILE, THW) with lane-dense spatial tiles."""
    padded_l = _round_up(L, 8)                 # f32 sublane padding
    col_bytes = padded_l * 4                   # bytes per (batch, spatial col)

    # Widest lane tile (multiple of 128) the budget allows at B_TILE = 1.
    max_lanes = max(128, (_BLOCK_BUDGET // col_bytes) // 128 * 128)
    if hw % 128 == 0:
        thw = min(hw, max_lanes)               # lane-dense, unmasked stores
    elif hw <= max_lanes:
        thw = hw                               # small ragged hw: full extent
    else:
        thw = max_lanes                        # ragged tail handled by cdiv grid

    # Grow the batch tile with the remaining budget (bigger blocks = less grid
    # overhead on this memory-bound op).
    b_tile = min(bs, max(1, _BLOCK_BUDGET // (col_bytes * thw)))
    if use_mxu:
        b_tile = min(b_tile, 8)                # keep the unrolled dot loop short
    if b_tile >= 8:
        b_tile = (b_tile // 8) * 8             # sublane-friendly batch tiles

    # Keep at least 2 grid steps so v7x can use both TensorCores.
    if pl.cdiv(bs, b_tile) * pl.cdiv(hw, thw) == 1:
        if thw >= 256:
            thw = _round_up((thw + 1) // 2, 128)
        elif b_tile >= 2:
            b_tile = (b_tile + 1) // 2
    return b_tile, thw


def charb_forward(x, gamma, s, labels=None):
    """Pallas TPU equivalent of charb.forward.

    x: (bs, L, H, W) float32 -> (bs, L, H, W)
    gamma, s: scalar parameters; labels: optional (L,) label values
    (defaults to arange(L), matching the module's labels=None path).
    """
    bs, L, H, W = x.shape
    hw = H * W

    gamma = jnp.asarray(gamma, jnp.float32)
    s = jnp.asarray(s, jnp.float32)
    if labels is None:
        labels = jnp.arange(L, dtype=jnp.float32)
    else:
        labels = jnp.asarray(labels, jnp.float32).reshape(L)

    # Grid-invariant Charbonnier weight matrix with exp(s) folded in; built
    # once here (tiny XLA op) and kept resident across all grid steps.
    diff = labels[None, :] - labels[:, None]
    w = (jnp.sqrt(gamma * gamma + diff * diff) - gamma) * jnp.exp(s)   # (L, L)

    use_mxu = L > _VPU_MAX_L
    b_tile, thw = _choose_tiles(bs, L, hw, use_mxu)
    grid = (pl.cdiv(bs, b_tile), pl.cdiv(hw, thw))

    x_flat = x.reshape(bs, L, hw)              # lane-dense spatial axis

    blk = pl.BlockSpec((b_tile, L, thw), lambda gb, gt: (gb, 0, gt))
    if use_mxu:
        kernel = _make_mxu_kernel(b_tile)
        w_spec = pl.BlockSpec((L, L), lambda gb, gt: (0, 0))   # VMEM, resident
    else:
        kernel = _make_vpu_kernel(L)
        w_spec = pl.BlockSpec(memory_space=pltpu.SMEM)         # cheap scalar reads

    out_flat = pl.pallas_call(
        kernel,
        out_shape=jax.ShapeDtypeStruct((bs, L, hw), x.dtype),
        grid=grid,
        in_specs=[w_spec, blk],
        out_specs=blk,
        compiler_params=pltpu.CompilerParams(
            dimension_semantics=("parallel", "parallel"),
            vmem_limit_bytes=_VMEM_LIMIT,
        ),
    )(w, x_flat)

    return out_flat.reshape(bs, L, H, W)


def _reference(x, gamma, s, labels=None):
    L = x.shape[1]
    if labels is None:
        labels = jnp.arange(L, dtype=jnp.float32)
    mu = jnp.sqrt(jnp.float32(gamma) ** 2
                  + (labels[None, :] - labels[:, None]) ** 2) - jnp.float32(gamma)
    out = jnp.einsum("oi,bihw->bohw", mu, x,
                     precision=jax.lax.Precision.HIGHEST)
    return out * jnp.exp(jnp.float32(s))


if __name__ == "__main__":
    gamma, s = 0.1, 0.3                       # module parameters (gamma init, s)

    # Small-L (VPU) path — matches the module's typical usage.
    x = jax.random.normal(jax.random.PRNGKey(0), (2, 4, 16, 16), dtype=jnp.float32)
    out = jax.block_until_ready(charb_forward(x, gamma, s))
    ref = _reference(x, gamma, s)
    assert out.shape == (2, 4, 16, 16)
    assert jnp.allclose(out, ref, rtol=1e-5, atol=1e-5), float(
        jnp.max(jnp.abs(out - ref)))

    # Larger-L (MXU) path.
    x2 = jax.random.normal(jax.random.PRNGKey(1), (2, 16, 16, 16), dtype=jnp.float32)
    out2 = jax.block_until_ready(charb_forward(x2, gamma, s))
    ref2 = _reference(x2, gamma, s)
    assert jnp.allclose(out2, ref2, rtol=1e-5, atol=1e-4), float(
        jnp.max(jnp.abs(out2 - ref2)))

    print("KERNEL_OK")
</pallas_src>

<mosaic_0001>
module attributes {stable_mosaic.version = 11 : i64} {
  func.func @kernel(%arg0: i32, %arg1: i32, %arg2: memref<4x4xf32, #tpu.memory_space<smem>>, %arg3: memref<2x4x128xf32, #tpu.memory_space<vmem>>, %arg4: memref<2x4x128xf32, #tpu.memory_space<vmem>>) attributes {dimension_semantics = [#tpu.dimension_semantics<parallel>, #tpu.dimension_semantics<parallel>], iteration_bounds = array<i64: 1, 2>, scalar_prefetch = 0 : i64, scratch_operands = 0 : i64, tpu.core_type = #tpu.core_type<tc>, window_params = [{transform_indices = @transform_0, window_bounds = array<i64: 4, 4>}, {transform_indices = @transform_1, window_bounds = array<i64: 2, 4, 128>}, {transform_indices = @transform_2, window_bounds = array<i64: 2, 4, 128>}]} {
    %c0 = arith.constant 0 : index
    %c0_0 = arith.constant 0 : index
    %c0_1 = arith.constant 0 : index
    %0 = vector.load %arg3[%c0, %c0_0, %c0_1] : memref<2x4x128xf32, #tpu.memory_space<vmem>>, vector<2x4x128xf32>
    %1 = vector.extract_strided_slice %0 {offsets = [0, 0, 0], sizes = [2, 1, 128], strides = [1, 1, 1]} : vector<2x4x128xf32> to vector<2x1x128xf32>
    %2 = vector.shape_cast %1 : vector<2x1x128xf32> to vector<2x128xf32>
    %3 = vector.extract_strided_slice %0 {offsets = [0, 1, 0], sizes = [2, 1, 128], strides = [1, 1, 1]} : vector<2x4x128xf32> to vector<2x1x128xf32>
    %4 = vector.shape_cast %3 : vector<2x1x128xf32> to vector<2x128xf32>
    %5 = vector.extract_strided_slice %0 {offsets = [0, 2, 0], sizes = [2, 1, 128], strides = [1, 1, 1]} : vector<2x4x128xf32> to vector<2x1x128xf32>
    %6 = vector.shape_cast %5 : vector<2x1x128xf32> to vector<2x128xf32>
    %7 = vector.extract_strided_slice %0 {offsets = [0, 3, 0], sizes = [2, 1, 128], strides = [1, 1, 1]} : vector<2x4x128xf32> to vector<2x1x128xf32>
    %8 = vector.shape_cast %7 : vector<2x1x128xf32> to vector<2x128xf32>
    %c0_2 = arith.constant 0 : index
    %c0_3 = arith.constant 0 : index
    %9 = memref.load %arg2[%c0_2, %c0_3] : memref<4x4xf32, #tpu.memory_space<smem>>
    %10 = vector.broadcast %9 : f32 to vector<2x128xf32>
    %11 = arith.mulf %10, %2 : vector<2x128xf32>
    %c0_4 = arith.constant 0 : index
    %c1 = arith.constant 1 : index
    %12 = memref.load %arg2[%c0_4, %c1] : memref<4x4xf32, #tpu.memory_space<smem>>
    %13 = vector.broadcast %12 : f32 to vector<2x128xf32>
    %14 = arith.mulf %13, %4 : vector<2x128xf32>
    %15 = arith.addf %11, %14 : vector<2x128xf32>
    %c0_5 = arith.constant 0 : index
    %c2 = arith.constant 2 : index
    %16 = memref.load %arg2[%c0_5, %c2] : memref<4x4xf32, #tpu.memory_space<smem>>
    %17 = vector.broadcast %16 : f32 to vector<2x128xf32>
    %18 = arith.mulf %17, %6 : vector<2x128xf32>
    %19 = arith.addf %15, %18 : vector<2x128xf32>
    %c0_6 = arith.constant 0 : index
    %c3 = arith.constant 3 : index
    %20 = memref.load %arg2[%c0_6, %c3] : memref<4x4xf32, #tpu.memory_space<smem>>
    %21 = vector.broadcast %20 : f32 to vector<2x128xf32>
    %22 = arith.mulf %21, %8 : vector<2x128xf32>
    %23 = arith.addf %19, %22 : vector<2x128xf32>
    %24 = vector.shape_cast %23 : vector<2x128xf32> to vector<2x1x128xf32>
    %c0_7 = arith.constant 0 : index
    %c0_8 = arith.constant 0 : index
    %c0_9 = arith.constant 0 : index
    %25 = vector.load %arg4[%c0_7, %c0_8, %c0_9] : memref<2x4x128xf32, #tpu.memory_space<vmem>>, vector<2x1x128xf32>
    tpu.vector_store %arg4[%c0_7, %c0_8, %c0_9], %24 {strides = array<i32>} : memref<2x4x128xf32, #tpu.memory_space<vmem>>, vector<2x1x128xf32>,
    %c1_10 = arith.constant 1 : index
    %c0_11 = arith.constant 0 : index
    %26 = memref.load %arg2[%c1_10, %c0_11] : memref<4x4xf32, #tpu.memory_space<smem>>
    %27 = vector.broadcast %26 : f32 to vector<2x128xf32>
    %28 = arith.mulf %27, %2 : vector<2x128xf32>
    %c1_12 = arith.constant 1 : index
    %c1_13 = arith.constant 1 : index
    %29 = memref.load %arg2[%c1_12, %c1_13] : memref<4x4xf32, #tpu.memory_space<smem>>
    %30 = vector.broadcast %29 : f32 to vector<2x128xf32>
    %31 = arith.mulf %30, %4 : vector<2x128xf32>
    %32 = arith.addf %28, %31 : vector<2x128xf32>
    %c1_14 = arith.constant 1 : index
    %c2_15 = arith.constant 2 : index
    %33 = memref.load %arg2[%c1_14, %c2_15] : memref<4x4xf32, #tpu.memory_space<smem>>
    %34 = vector.broadcast %33 : f32 to vector<2x128xf32>
    %35 = arith.mulf %34, %6 : vector<2x128xf32>
    %36 = arith.addf %32, %35 : vector<2x128xf32>
    %c1_16 = arith.constant 1 : index
    %c3_17 = arith.constant 3 : index
    %37 = memref.load %arg2[%c1_16, %c3_17] : memref<4x4xf32, #tpu.memory_space<smem>>
    %38 = vector.broadcast %37 : f32 to vector<2x128xf32>
    %39 = arith.mulf %38, %8 : vector<2x128xf32>
    %40 = arith.addf %36, %39 : vector<2x128xf32>
    %41 = vector.shape_cast %40 : vector<2x128xf32> to vector<2x1x128xf32>
    %c0_18 = arith.constant 0 : index
    %c1_19 = arith.constant 1 : index
    %c0_20 = arith.constant 0 : index
    %42 = vector.load %arg4[%c0_18, %c1_19, %c0_20] : memref<2x4x128xf32, #tpu.memory_space<vmem>>, vector<2x1x128xf32>
    tpu.vector_store %arg4[%c0_18, %c1_19, %c0_20], %41 {strides = array<i32>} : memref<2x4x128xf32, #tpu.memory_space<vmem>>, vector<2x1x128xf32>,
    %c2_21 = arith.constant 2 : index
    %c0_22 = arith.constant 0 : index
    %43 = memref.load %arg2[%c2_21, %c0_22] : memref<4x4xf32, #tpu.memory_space<smem>>
    %44 = vector.broadcast %43 : f32 to vector<2x128xf32>
    %45 = arith.mulf %44, %2 : vector<2x128xf32>
    %c2_23 = arith.constant 2 : index
    %c1_24 = arith.constant 1 : index
    %46 = memref.load %arg2[%c2_23, %c1_24] : memref<4x4xf32, #tpu.memory_space<smem>>
    %47 = vector.broadcast %46 : f32 to vector<2x128xf32>
    %48 = arith.mulf %47, %4 : vector<2x128xf32>
    %49 = arith.addf %45, %48 : vector<2x128xf32>
    %c2_25 = arith.constant 2 : index
    %c2_26 = arith.constant 2 : index
    %50 = memref.load %arg2[%c2_25, %c2_26] : memref<4x4xf32, #tpu.memory_space<smem>>
    %51 = vector.broadcast %50 : f32 to vector<2x128xf32>
    %52 = arith.mulf %51, %6 : vector<2x128xf32>
    %53 = arith.addf %49, %52 : vector<2x128xf32>
    %c2_27 = arith.constant 2 : index
    %c3_28 = arith.constant 3 : index
    %54 = memref.load %arg2[%c2_27, %c3_28] : memref<4x4xf32, #tpu.memory_space<smem>>
    %55 = vector.broadcast %54 : f32 to vector<2x128xf32>
    %56 = arith.mulf %55, %8 : vector<2x128xf32>
    %57 = arith.addf %53, %56 : vector<2x128xf32>
    %58 = vector.shape_cast %57 : vector<2x128xf32> to vector<2x1x128xf32>
    %c0_29 = arith.constant 0 : index
    %c2_30 = arith.constant 2 : index
    %c0_31 = arith.constant 0 : index
    %59 = vector.load %arg4[%c0_29, %c2_30, %c0_31] : memref<2x4x128xf32, #tpu.memory_space<vmem>>, vector<2x1x128xf32>
    tpu.vector_store %arg4[%c0_29, %c2_30, %c0_31], %58 {strides = array<i32>} : memref<2x4x128xf32, #tpu.memory_space<vmem>>, vector<2x1x128xf32>,
    %c3_32 = arith.constant 3 : index
    %c0_33 = arith.constant 0 : index
    %60 = memref.load %arg2[%c3_32, %c0_33] : memref<4x4xf32, #tpu.memory_space<smem>>
    %61 = vector.broadcast %60 : f32 to vector<2x128xf32>
    %62 = arith.mulf %61, %2 : vector<2x128xf32>
    %c3_34 = arith.constant 3 : index
    %c1_35 = arith.constant 1 : index
    %63 = memref.load %arg2[%c3_34, %c1_35] : memref<4x4xf32, #tpu.memory_space<smem>>
    %64 = vector.broadcast %63 : f32 to vector<2x128xf32>
    %65 = arith.mulf %64, %4 : vector<2x128xf32>
    %66 = arith.addf %62, %65 : vector<2x128xf32>
    %c3_36 = arith.constant 3 : index
    %c2_37 = arith.constant 2 : index
    %67 = memref.load %arg2[%c3_36, %c2_37] : memref<4x4xf32, #tpu.memory_space<smem>>
    %68 = vector.broadcast %67 : f32 to vector<2x128xf32>
    %69 = arith.mulf %68, %6 : vector<2x128xf32>
    %70 = arith.addf %66, %69 : vector<2x128xf32>
    %c3_38 = arith.constant 3 : index
    %c3_39 = arith.constant 3 : index
    %71 = memref.load %arg2[%c3_38, %c3_39] : memref<4x4xf32, #tpu.memory_space<smem>>
    %72 = vector.broadcast %71 : f32 to vector<2x128xf32>
    %73 = arith.mulf %72, %8 : vector<2x128xf32>
    %74 = arith.addf %70, %73 : vector<2x128xf32>
    %75 = vector.shape_cast %74 : vector<2x128xf32> to vector<2x1x128xf32>
    %c0_40 = arith.constant 0 : index
    %c3_41 = arith.constant 3 : index
    %c0_42 = arith.constant 0 : index
    %76 = vector.load %arg4[%c0_40, %c3_41, %c0_42] : memref<2x4x128xf32, #tpu.memory_space<vmem>>, vector<2x1x128xf32>
    tpu.vector_store %arg4[%c0_40, %c3_41, %c0_42], %75 {strides = array<i32>} : memref<2x4x128xf32, #tpu.memory_space<vmem>>, vector<2x1x128xf32>,
    return
  }
  func.func @transform_0(%arg0: i32, %arg1: i32) -> (i32, i32) {
    %c0_i32 = arith.constant 0 : i32
    %c0_i32_0 = arith.constant 0 : i32
    %c0_i32_1 = arith.constant 0 : i32
    return %c0_i32, %c0_i32_0 : i32, i32
  }
  func.func @transform_1(%arg0: i32, %arg1: i32) -> (i32, i32, i32) {
    %c0_i32 = arith.constant 0 : i32
    %c0_i32_0 = arith.constant 0 : i32
    return %arg0, %c0_i32, %arg1 : i32, i32, i32
  }
  func.func @transform_2(%arg0: i32, %arg1: i32) -> (i32, i32, i32) {
    %c0_i32 = arith.constant 0 : i32
    %c0_i32_0 = arith.constant 0 : i32
    return %arg0, %c0_i32, %arg1 : i32, i32, i32
  }
}

</mosaic_0001>

<bundles_post_ra>
// kernel: tpu_custom_call.1
= control target key start
LH: loop header
LB: loop body
LE: loop exit
PB: predicated region body
PF: predicated region fallthrough
CT: control target
= control target key end

     0   :  { %7 = vsyncpa [#allocation5], 0  ;;  %s1029_s0 = inlined_call_operand.hbm [shape: f32[4,4], index: 0, kind: input, shape index: {}]   ;;  %s1030_s1 = inlined_call_operand.hbm [shape: f32[2,4,256], index: 1, kind: input, shape index: {}]   ;;  %s1031_s2 = inlined_call_operand.hbm [shape: f32[2,4,256], index: 2, kind: output, shape index: {}]  }
   0x1   :  { %8 = vsyncpa [#allocation3], 0 }
   0x2   :  { %10 = vsyncpa [#allocation3 + $0x1], 0 }
   0x3   :  { %11 = vsyncpa [#allocation4], 0 }
   0x4   :  { %13 = vsyncpa [#allocation4 + $0x1], 0  ;;  %s741_s9 = smov 0   ;;  %s743_s10 = smov 0  }
   0x5   :  { %s745_s11 = smov 0   ;;  %s747_s12 = smov 0  }
   0x6   :  { %s749_s13 = smov 0   ;;  %s751_s14 = smov 0  }
   0x7 LB: > { %s477_s15 = sadd.s32 4294967295, %s715_s14   ;;  %s478_s16 = sadd.s32 4294967294, %s715_s14   ;;  %s715_s14 = sphi %s751_s14, %s19_s14   ;;  %s711_s13 = sphi %s749_s13, %s1051_s13   ;;  %s707_s12 = sphi %s747_s12, %s1050_s12   ;;  %s703_s11 = sphi %s745_s11, %s1049_s11   ;;  %s699_s10 = sphi %s743_s10, %s1048_s10   ;;  %s695_s9 = sphi %s741_s9, %s1047_s9  }
   0x8   : > { %s61_s17 = sadd.s32 1, %s703_s11  ;;  %p68_p0 = scmp.ne.s32.totalorder %s703_s11, %s699_s10 }
   0x9   : > { %p69_p1 = scmp.eq.s32.totalorder %s715_s14, 0  ;;  %p74_p2 = scmp.ne.s32.totalorder %s699_s10, %s695_s9 }
   0xa   : > { %p779_p3 = scmp.eq.s32.totalorder %s477_s15, 0  ;;  %p100_p4 = scmp.eq.s32.totalorder %s477_s15, 1 }
   0xb   : > { %p70_p5 = por %p69_p1, %p68_p0  ;;  %p106_p6 = scmp.eq.s32.totalorder %s478_s16, 1 }
   0xc   : > { %s1036_s18 = scalar_select %p779_p3, 1, 0 }
   0xd   : > { %p785_p7 = por %p779_p3, %p74_p2  ;;  %p789_p8 = por %p100_p4, %p68_p0 }
   0xe   : > { %p793_p9 = por %p106_p6, %p74_p2  ;;  %p479_p10 = scmp.ge.s32.totalorder %s715_s14, 1 }
   0xf   : > { %s1037_s19 = scalar_select %p785_p7, 1, 0 }
  0x10   : > { %s1038_s20 = scalar_select %p789_p8, 1, 0 }
  0x11   : > { %s1039_s21 = scalar_select %p793_p9, 1, 0 }
  0x12   : > { %p113_p11 = scmp.lt.s32.totalorder %s715_s14, 3  ;;  %p528_p1 = scmp.lt.s32.totalorder %s715_s14, 2 }
  0x13   : > { %s135_s23 = sand.u32 1, %s703_s11   ;;  %s28_s25 = sadd.s32 1, %s711_s13 }
  0x14   : > { %p800_p13 = pnand %p479_p10, %p113_p11  ;;  %p808_p0 = pnand %p528_p1, %p70_p5 }
  0x15   : > { %s482_s26 = sshll.u32 %s135_s23, 3  ;;  %p29_p4 = scmp.ge.s32.totalorder %s28_s25, 2 }
  0x16   : > { %p515_p7 = pneg %p800_p13  ;;  %s586_s29 = scalar_lea.hbm %s1029_s0, 64 }
  0x17   : > { %p587_p6 = scmp.ne.s32.totalorder %s1029_s0, %s586_s29  ;;  %p593_p5 = scmp.lt.u32.totalorder %s586_s29, %s1029_s0 }
  0x18   : > { %p516_p2 = pnand %p515_p7, %p779_p3 }
  0x1a   : > { %p588_p10 = pneg %p516_p2 }
  0x1c   : > { %p589_p11 = pnand %p588_p10, %p587_p6 }
  0x1e   : > { %p590_p12 = pneg %p589_p11 }
  0x20   : > { %p595_p1 = pnand %p593_p5, %p590_p12 }
  0x22   : > { %598 = shalt.err (!%p595_p1)
}
  0x23   : > { %s717_s6 = smov [#allocation2]   ;;  %s1053_s25 = smov (%p29_p4, %s28_s25), 0 }
  0x24   : > { %518 = dma.hbm_to_smem (!%p516_p2), %s1029_s0, 64, %s717_s6, [#allocation5]  }
  0x25   : > { %s483_s15 = sshll.u32 %s711_s13, 6  ;;  %s57_s16 = ssub.s32 %s711_s13, %s1053_s25 }
  0x26   : > { %s835_s29 = scalar_lea.hbm %s1030_s1, %s483_s15  ;;  %p59_p7 = scmp.eq.s32.totalorder %s57_s16, 0 }
  0x27   : > { %s139_s30 = scalar_lea.vmem [#allocation6], %s482_s26  ;;  %s844_s5 = scalar_lea.sflag [#allocation3], %s135_s23 }
  0x28   : > { %s148_s3 = sshll.u32 %s139_s30, 4  ;;  %s599_s6 = scalar_lea.hbm %s835_s29, 128  ;;  %s837_s3 = int_to_ptr.vmem [resolvable:$true] %s148_s3 }
  0x29   : > { %s842_s4 = scalar_select %p59_p7, %s703_s11, %s61_s17  }
  0x2a   : > { %p600_p12 = scmp.ne.s32.totalorder %s835_s29, %s599_s6  ;;  %p601_p2 = pneg %p808_p0 }
  0x2b   : > { %s604_s26 = scalar_lea.hbm %s1030_s1, 256  ;;  %p605_p10 = scmp.lt.u32.totalorder %s835_s29, %s1030_s1 }
  0x2c   : > { %p602_p4 = pnand %p601_p2, %p600_p12  ;;  %p606_p11 = scmp.lt.u32.totalorder %s604_s26, %s599_s6 }
  0x2d   : > { %p608_p1 = scmp.lt.u32.totalorder %s599_s6, %s835_s29 }
  0x2e   : > { %p603_p6 = pneg %p602_p4  ;;  %p607_p5 = por %p606_p11, %p605_p10 }
  0x30   : > { %p609_p7 = por %p608_p1, %p607_p5 }
  0x32   : > { %p610_p9 = pnand %p609_p7, %p603_p6 }
  0x34   : > { %613 = shalt.err (!%p610_p9)
}
  0x35   : > { %s614_s17 = scalar_lea.vmem %s837_s3, 128  ;;  %s718_s23 = smov [#allocation6]  }
  0x36   : > { %p615_p12 = scmp.ne.s32.totalorder %s837_s3, %s614_s17  ;;  %s619_s27 = sshll.u32 %s718_s23, 4  ;;  %s620_s27 = int_to_ptr.vmem [resolvable:$false] %s619_s27 }
  0x37   : > { %s621_s28 = scalar_lea.vmem %s620_s27, 256  ;;  %p622_p3 = scmp.lt.s32.totalorder %s837_s3, %s620_s27 }
  0x38   : > { %p617_p4 = pnand %p615_p12, %p601_p2  ;;  %p623_p10 = scmp.lt.s32.totalorder %s621_s28, %s614_s17 }
  0x3a   : > { %p618_p8 = pneg %p617_p4  ;;  %p624_p11 = por %p623_p10, %p622_p3 }
  0x3c   : > { %p625_p5 = pnand %p624_p11, %p618_p8 }
  0x3e   : > { %628 = shalt.err (!%p625_p5)
}
  0x3f   : > { %s719_s30 = smov 128   ;;  %s720_s6 = smov 64  }
  0x40   : > { %s721_s7 = smov 4   ;;  %160 = sbr.rel (%p800_p13) target bundleno = 129 (0x81), region = 28 }
  0x41   : > { %522 = dma.hbm_to_vmem [thread:$0]  (!%p808_p0), %s835_s29, 128, %s837_s3, %s844_s5, %s719_s30, %s720_s6, %s721_s7  }
  0x42   : > { %p1042_p9 = scmp.ne.s32.totalorder (!%p800_p13), %s1036_s18, 0 }
  0x47   : > { %682 = dma.done.wait (%p1042_p9), [#allocation5], 64  }
  0x48   : > { %684 = vsyncadd (%p1042_p9), [#allocation5], 4294967232  ;;  %s879_s8 = sand.u32 1, %s699_s10   ;;  %p1043_p3 = scmp.ne.s32.totalorder %s1037_s19, 0 }
  0x49   : > { %s486_s26 = sshll.u32 %s879_s8, 3  ;;  %s167_s15 = scalar_lea.sflag [#allocation3], %s879_s8 }
  0x4a   : > { %s170_s24 = scalar_lea.vmem [#allocation6], %s486_s26 }
  0x4b   : > { %686 = dma.done.wait (%p1043_p3), %s167_s15, 128  }
  0x4c   : > { %688 = vsyncadd (%p1043_p3), %s167_s15, 4294967168 }
  0x4d   : > { %175 = sfence }
  0x4e   : > { %s196_s22 = sld [smem:[#allocation2]]  ;;  %s488_s18 = sld [smem:[#allocation2 + $0x1]]  ;;  %v895_v0 = vld [vmem:[%s170_s24] sm:$0xf]  ;;  %v897_v1 = vld [vmem:[%s170_s24 + $0x4] sm:$0xf] }
  0x4f   : > { %s489_s29 = sld [smem:[#allocation2 + $0x2]]  ;;  %s490_s3 = sld [smem:[#allocation2 + $0x3]] }
  0x50   : > { %s889_s5 = sld [smem:[#allocation2 + $0x80]]  ;;  %s891_s16 = sld [smem:[#allocation2 + $0x81]] }
  0x51   : > { %s893_s17 = sld [smem:[#allocation2 + $0x82]]  ;;  %s899_s23 = sld [smem:[#allocation2 + $0x83]] }
  0x52   : > { %s910_s19 = sld [smem:[#allocation2 + $0x100]]  ;;  %s912_s27 = sld [smem:[#allocation2 + $0x101]] }
  0x53   : > { %s915_s28 = sld [smem:[#allocation2 + $0x102]]  ;;  %s918_s30 = sld [smem:[#allocation2 + $0x103]] }
  0x54   : > { %v197_v2 = vstv %s196_s22  ;;  %v201_v4 = vstv %s488_s18  ;;  %s927_s6 = sld [smem:[#allocation2 + $0x180]]  ;;  %s931_s7 = sld [smem:[#allocation2 + $0x181]] }
  0x55   : > { %v198_v3 = vmul.f32 %v197_v2, %v895_v0  ;;  %v213_v5 = vstv %s489_s29  ;;  %v199_v6 = vmul.f32 %v197_v2, %v897_v1  ;;  %v202_v7 = vmul.f32 %v201_v4, %v895_v0  ;;  %s933_s15 = sld [smem:[#allocation2 + $0x182]]  ;;  %s936_s24 = sld [smem:[#allocation2 + $0x183]] }
  0x56   : > { %v214_v8 = vmul.f32 %v213_v5, %v895_v0  ;;  %v225_v9 = vstv %s490_s3  ;;  %v203_v10 = vmul.f32 %v201_v4, %v897_v1  ;;  %v215_v12 = vmul.f32 %v213_v5, %v897_v1  ;;  %s940_s22 = scalar_lea.vmem [#allocation7], %s486_s26  ;;  %s504_s18 = sshll.u32 %s707_s12, 6 }
  0x57   : > { %v226_v11 = vmul.f32 %v225_v9, %v895_v0  ;;  %v227_v13 = vmul.f32 %v225_v9, %v897_v1  ;;  %v239_v14 = vstv %s889_s5  ;;  %v206_v15 = vrot.slane %v202_v7, 1  ;;  %s380_s26 = sshll.u32 %s940_s22, 4  ;;  %s978_s5 = scalar_lea.hbm %s1031_s2, %s504_s18  ;;  %s973_s26 = int_to_ptr.vmem [resolvable:$true] %s380_s26 }
  0x58   : > { %v218_v16 = vrot.slane %v214_v8, 2  ;;  %v207_v17 = vrot.slane %v203_v10, 1  ;;  %v240_v18 = vmul.f32 %v239_v14, %v895_v0  ;;  %v219_v20 = vrot.slane %v215_v12, 2  ;;  %p1044_p13 = scmp.ne.s32.totalorder %s1038_s20, 0  ;;  %s722_s12 = smov [#allocation7]  }
  0x59   : > { %v230_v19 = vrot.slane %v226_v11, 3  ;;  %v231_v21 = vrot.slane %v227_v13, 3  ;;  %v243_v22 = vstv %s891_s16  ;;  %v210_v23 = vadd.f32 %v206_v15, %v198_v3  ;;  %s365_s16 = scalar_lea.sflag [#allocation4], %s879_s8 }
  0x5a   : > { %v211_v24 = vadd.f32 %v207_v17, %v199_v6  ;;  %v244_v25 = vmul.f32 %v243_v22, %v895_v0  ;;  %v255_v26 = vstv %s893_s17  ;;  %v267_v28 = vstv %s899_s23  ;;  %s629_s17 = scalar_lea.vmem %s973_s26, 128  ;;  %s633_s23 = sshll.u32 %s722_s12, 4  ;;  %s634_s23 = int_to_ptr.vmem [resolvable:$false] %s633_s23 }
  0x5b   : > { %v256_v27 = vmul.f32 %v255_v26, %v895_v0  ;;  %v241_v29 = vmul.f32 %v239_v14, %v897_v1  ;;  %v245_v30 = vmul.f32 %v243_v22, %v897_v1  ;;  %v222_v31 = vadd.f32 %v218_v16, %v210_v23  ;;  %p630_p8 = scmp.ne.s32.totalorder %s973_s26, %s629_s17  ;;  %p636_p6 = scmp.lt.s32.totalorder %s973_s26, %s634_s23 }
  0x5c   : > { %v223_v32 = vadd.f32 %v219_v20, %v211_v24  ;;  %v248_v33 = vrot.slane %v244_v25, 1  ;;  %v268_v34 = vmul.f32 %v267_v28, %v895_v0  ;;  %v257_v37 = vmul.f32 %v255_v26, %v897_v1 }
  0x5d   : > { %v260_v35 = vrot.slane %v256_v27, 2  ;;  %v249_v36 = vrot.slane %v245_v30, 1  ;;  %v269_v38 = vmul.f32 %v267_v28, %v897_v1  ;;  %v234_v39 = vadd.f32 %v230_v19, %v222_v31  ;;  %p631_p0 = pnand %p630_p8, %p1044_p13 }
  0x5e   : > { %v235_v40 = vadd.f32 %v231_v21, %v223_v32  ;;  %v252_v41 = vadd.f32 %v248_v33, %v240_v18  ;;  %v272_v42 = vrot.slane %v268_v34, 3  ;;  %v261_v44 = vrot.slane %v257_v37, 2 }
  0x5f   : > { %v253_v43 = vadd.f32 %v249_v36, %v241_v29  ;;  %v273_v45 = vrot.slane %v269_v38, 3  ;;  %v281_v46 = vstv %s910_s19  ;;  %236 = vst [vmem:[%s940_s22] sm:$0x1] %v234_v39  ;;  %v285_v49 = vstv %s912_s27  ;;  %p632_p2 = pneg %p631_p0  ;;  %s635_s19 = scalar_lea.vmem %s634_s23, 256 }
  0x60   : > { %237 = vst [vmem:[%s940_s22 + $0x4] sm:$0x1] %v235_v40  ;;  %v264_v47 = vadd.f32 %v260_v35, %v252_v41  ;;  %v282_v48 = vmul.f32 %v281_v46, %v895_v0  ;;  %v297_v50 = vstv %s915_s28  ;;  %v286_v52 = vmul.f32 %v285_v49, %v895_v0  ;;  %p637_p1 = scmp.lt.s32.totalorder %s635_s19, %s629_s17 }
  0x61   : > { %v265_v51 = vadd.f32 %v261_v44, %v253_v43  ;;  %v298_v53 = vmul.f32 %v297_v50, %v895_v0  ;;  %v309_v54 = vstv %s918_s30  ;;  %v283_v57 = vmul.f32 %v281_v46, %v897_v1 }
  0x62   : > { %v276_v55 = vadd.f32 %v272_v42, %v264_v47  ;;  %v310_v56 = vmul.f32 %v309_v54, %v895_v0  ;;  %v287_v58 = vmul.f32 %v285_v49, %v897_v1  ;;  %v290_v60 = vrot.slane %v286_v52, 1  ;;  %p638_p7 = por %p637_p1, %p636_p6 }
  0x63   : > { %v277_v59 = vadd.f32 %v273_v45, %v265_v51  ;;  %v302_v61 = vrot.slane %v298_v53, 2  ;;  %v299_v62 = vmul.f32 %v297_v50, %v897_v1  ;;  %v311_v3 = vmul.f32 %v309_v54, %v897_v1 }
  0x64   : > { %278 = vst [vmem:[%s940_s22 + $0x1] sm:$0x1] %v276_v55  ;;  %v314_v63 = vrot.slane %v310_v56, 3  ;;  %v291_v2 = vrot.slane %v287_v58, 1  ;;  %v323_v4 = vstv %s927_s6  ;;  %v294_v5 = vadd.f32 %v290_v60, %v282_v48  ;;  %p639_p12 = pnand %p638_p7, %p632_p2 }
  0x65   : > { %279 = vst [vmem:[%s940_s22 + $0x5] sm:$0x1] %v277_v59  ;;  %v303_v6 = vrot.slane %v299_v62, 2  ;;  %v324_v7 = vmul.f32 %v323_v4, %v895_v0  ;;  %v327_v8 = vstv %s931_s7  ;;  %v315_v10 = vrot.slane %v311_v3, 3 }
  0x66   : > { %v295_v9 = vadd.f32 %v291_v2, %v283_v57  ;;  %v328_v11 = vmul.f32 %v327_v8, %v895_v0  ;;  %v339_v12 = vstv %s933_s15  ;;  %v306_v13 = vadd.f32 %v302_v61, %v294_v5 }
  0x67   : > { %v340_v14 = vmul.f32 %v339_v12, %v895_v0  ;;  %v351_v15 = vstv %s936_s24  ;;  %v325_v16 = vmul.f32 %v323_v4, %v897_v1  ;;  %v329_v20 = vmul.f32 %v327_v8, %v897_v1 }
  0x68   : > { %v307_v17 = vadd.f32 %v303_v6, %v295_v9  ;;  %v332_v18 = vrot.slane %v328_v11, 1  ;;  %v352_v19 = vmul.f32 %v351_v15, %v895_v0  ;;  %v318_v21 = vadd.f32 %v314_v63, %v306_v13 }
  0x69   : > { %v344_v22 = vrot.slane %v340_v14, 2  ;;  %v341_v23 = vmul.f32 %v339_v12, %v897_v1  ;;  %v353_v24 = vmul.f32 %v351_v15, %v897_v1  ;;  %v333_v28 = vrot.slane %v329_v20, 1 }
  0x6a   : > { %v319_v25 = vadd.f32 %v315_v10, %v307_v17  ;;  %v336_v26 = vadd.f32 %v332_v18, %v324_v7  ;;  %v356_v27 = vrot.slane %v352_v19, 3  ;;  %320 = vst [vmem:[%s940_s22 + $0x2] sm:$0x1] %v318_v21 }
  0x6b   : > { %v345_v29 = vrot.slane %v341_v23, 2  ;;  %v337_v30 = vadd.f32 %v333_v28, %v325_v16  ;;  %v357_v31 = vrot.slane %v353_v24, 3 }
  0x6c   : > { %321 = vst [vmem:[%s940_s22 + $0x6] sm:$0x1] %v319_v25  ;;  %v348_v0 = vadd.f32 %v344_v22, %v336_v26 }
  0x6d   : > { %v349_v32 = vadd.f32 %v345_v29, %v337_v30 }
  0x6e   : > { %v360_v1 = vadd.f32 %v356_v27, %v348_v0 }
  0x6f   : > { %v361_v33 = vadd.f32 %v357_v31, %v349_v32 }
  0x70   : > { %362 = vst [vmem:[%s940_s22 + $0x3] sm:$0x1] %v360_v1 }
  0x71   : > { %363 = vst [vmem:[%s940_s22 + $0x7] sm:$0x1] %v361_v33 }
  0x72   : > { %642 = shalt.err (!%p639_p12)
}
  0x73   : > { %s643_s27 = scalar_lea.hbm %s978_s5, 128  ;;  %s647_s6 = scalar_lea.hbm %s1031_s2, 256 }
  0x74   : > { %p644_p4 = scmp.ne.s32.totalorder %s978_s5, %s643_s27  ;;  %p648_p5 = scmp.lt.u32.totalorder %s978_s5, %s1031_s2 }
  0x75   : > { %p649_p9 = scmp.lt.u32.totalorder %s647_s6, %s643_s27  ;;  %p651_p8 = scmp.lt.u32.totalorder %s643_s27, %s978_s5 }
  0x76   : > { %p645_p10 = pnand %p644_p4, %p1044_p13 }
  0x77   : > { %p650_p3 = por %p649_p9, %p648_p5 }
  0x78   : > { %p646_p11 = pneg %p645_p10 }
  0x79   : > { %p652_p0 = por %p651_p8, %p650_p3 }
  0x7b   : > { %p653_p2 = pnand %p652_p0, %p646_p11 }
  0x7d   : > { %656 = shalt.err (!%p653_p2)
}
  0x7e   : > { %s723_s24 = smov 64   ;;  %s724_s22 = smov 128  }
  0x7f   : > { %s725_s18 = smov 4  }
  0x80   : > { %513 = dma.vmem_to_hbm [thread:$0]  (%p1044_p13), %s973_s26, 128, %s978_s5, %s365_s16, %s723_s24, %s724_s22, %s725_s18  }
  0x81 PF: > { %s395_s29 = sand.u32 1, %s695_s9   ;;  %p1045_p6 = scmp.ne.s32.totalorder %s1039_s21, 0 }
  0x82   : > { %p1046_p1 = scmp.ge.s32.totalorder %s715_s14, 2  ;;  %s396_s3 = scalar_lea.sflag [#allocation4], %s395_s29 }
  0x84   : > { %p524_p7 = pnand %p1046_p1, %p1045_p6 }
  0x86   : > { %690 = dma.done.wait (!%p524_p7), %s396_s3, 128  }
  0x87   : > { %692 = vsyncadd (!%p524_p7), %s396_s3, 4294967168  ;;  %s19_s14 = sadd.s32 1, %s715_s14   ;;  %s1047_s9 = smov %s699_s10 }
  0x88   : > { %p16_p12 = scmp.ge.s32.totalorder %s19_s14, 4   ;;  %s1048_s10 = smov %s703_s11 }
  0x89   : > { %s1049_s11 = smov %s842_s4  ;;  %s1050_s12 = smov %s711_s13 }
  0x8a   : > { %s1051_s13 = smov %s1053_s25  ;;  %18 = sbr.rel (!%p16_p12) target bundleno = 7 (0x7), region = 78 }
  0x91   :  { %401 = vsyncpa [#allocation3], 1 }
  0x92   :  { %403 = vsyncpa [#allocation3 + $0x1], 1 }
  0x93   :  { %404 = vsyncpa [#allocation4], 1 }
  0x94   :  { %406 = vsyncpa [#allocation4 + $0x1], 1 }
  0x95   :  { %407 = vsyncpa [#allocation5], 1 }
  0x96   :  { %409 = vsyncpa [#allocation5 + $0x1], 1 }

</bundles_post_ra>
